<compile_context>
chip_gen: v7x
topology: tpu7x:2x2x1
jax: 0.10.0
libtpu: 0.0.40
codegen_flags: <defaults>
</compile_context>

<pallas_src>
from functools import partial

import jax
import jax.numpy as jnp
from jax.experimental import pallas as pl
from jax.experimental.pallas import tpu as pltpu


def _acp_kernel(x_ref, mx_ref, av_ref, mx_acc, sum_acc, *,
                hw: int, tile_s: int, need_mask: bool):
    # x_ref   : VMEM (TILE_R, TILE_S) input tile
    # mx_ref  : VMEM (TILE_R, 1) max output
    # av_ref  : VMEM (TILE_R, 1) avg output
    # mx_acc, sum_acc : f32 VMEM scratch accumulators (persist across k)
    k = pl.program_id(1)

    @pl.when(k == 0)
    def _():
        mx_acc[...] = jnp.full_like(mx_acc, -jnp.inf)
        sum_acc[...] = jnp.zeros_like(sum_acc)

    x = x_ref[...].astype(jnp.float32)                       # (TILE_R, TILE_S)
    if need_mask:
        # Only lanes < hw are real data; the wrapper zero-pads the rest.
        lane = jax.lax.broadcasted_iota(jnp.int32, x.shape, 1) + k * tile_s
        valid = lane < hw
        x_for_max = jnp.where(valid, x, -jnp.inf)
        x_for_sum = jnp.where(valid, x, 0.0)
    else:
        x_for_max = x
        x_for_sum = x

    mx_acc[...] = jnp.maximum(mx_acc[...],
                              jnp.max(x_for_max, axis=-1, keepdims=True))
    sum_acc[...] = sum_acc[...] + jnp.sum(x_for_sum, axis=-1, keepdims=True)

    @pl.when(k == pl.num_programs(1) - 1)
    def _():
        mx_ref[...] = mx_acc[...].astype(mx_ref.dtype)
        av_ref[...] = (sum_acc[...] * (1.0 / hw)).astype(av_ref.dtype)


def _round_up(x: int, m: int) -> int:
    return ((x + m - 1) // m) * m


def adaptive_concat_pool2d(x: jax.Array) -> jax.Array:
    """AdaptiveConcatPool2d((1,1)): (B, C, H, W) -> (B, 2C, 1, 1), max then avg."""
    B, C, H, W = x.shape
    rows = B * C
    hw = H * W
    itemsize = jnp.dtype(x.dtype).itemsize
    sub = {4: 8, 2: 16, 1: 32}.get(itemsize, 8)       # sublane granularity by dtype

    # ---- tile sizing: keep double-buffered input block ~<= 8 MiB total ----
    budget = 4 * 1024 * 1024                          # bytes per input block (one buffer)
    hw_pad = _round_up(hw, 128)                       # lane-dense spatial axis
    max_tile_s = max(128, (budget // (sub * itemsize)) // 128 * 128)
    tile_s = min(hw_pad, max_tile_s)                  # spatial chunk (reduction axis)
    hw_pad = _round_up(hw_pad, tile_s)

    max_tile_r = max(sub, (budget // (tile_s * itemsize)) // sub * sub)
    tile_r = min(max_tile_r, _round_up(rows, sub))    # row tile (parallel axis)
    rows_pad = _round_up(rows, tile_r)

    grid = (rows_pad // tile_r, hw_pad // tile_s)     # reduction axis LAST
    need_mask = hw_pad != hw

    x2 = x.reshape(rows, hw)
    if rows_pad != rows or hw_pad != hw:
        x2 = jnp.pad(x2, ((0, rows_pad - rows), (0, hw_pad - hw)))

    kernel = partial(_acp_kernel, hw=hw, tile_s=tile_s, need_mask=need_mask)

    mx, av = pl.pallas_call(
        kernel,
        out_shape=(jax.ShapeDtypeStruct((rows_pad, 1), x.dtype),
                   jax.ShapeDtypeStruct((rows_pad, 1), x.dtype)),
        grid_spec=pltpu.PrefetchScalarGridSpec(
            num_scalar_prefetch=0,
            grid=grid,
            in_specs=[pl.BlockSpec((tile_r, tile_s), lambda i, k: (i, k))],
            out_specs=[pl.BlockSpec((tile_r, 1), lambda i, k: (i, 0)),
                       pl.BlockSpec((tile_r, 1), lambda i, k: (i, 0))],
            scratch_shapes=[pltpu.VMEM((tile_r, 1), jnp.float32),
                            pltpu.VMEM((tile_r, 1), jnp.float32)],
        ),
        compiler_params=pltpu.CompilerParams(
            dimension_semantics=("parallel", "arbitrary")),
        cost_estimate=pl.CostEstimate(
            flops=2 * rows_pad * hw_pad,
            transcendentals=0,
            bytes_accessed=rows_pad * hw_pad * itemsize + 2 * rows_pad * itemsize),
    )(x2)

    mx = mx[:rows].reshape(B, C, 1, 1)
    av = av[:rows].reshape(B, C, 1, 1)
    # torch.cat([max, avg], dim=1)
    return jnp.concatenate([mx, av], axis=1)


if __name__ == "__main__":
    key = jax.random.PRNGKey(0)
    B, C, H, W = 2, 4, 16, 16
    x = jax.random.normal(key, (B, C, H, W), dtype=jnp.float32)

    y = adaptive_concat_pool2d(x)
    y = jax.block_until_ready(y)

    # pure-JAX reference check: concat([adaptive_max_pool, adaptive_avg_pool], axis=1)
    ref = jnp.concatenate([jnp.max(x, axis=(2, 3), keepdims=True),
                           jnp.mean(x, axis=(2, 3), keepdims=True)], axis=1)
    assert y.shape == (B, 2 * C, 1, 1), y.shape
    assert jnp.allclose(y, ref, rtol=1e-5, atol=1e-5), (y, ref)

    print("KERNEL_OK")
</pallas_src>

<mosaic_0001>
module attributes {stable_mosaic.version = 11 : i64} {
  func.func @_acp_kernel(%arg0: i32, %arg1: i32, %arg2: memref<8x256xf32, #tpu.memory_space<vmem>>, %arg3: memref<8x1xf32, #tpu.memory_space<vmem>>, %arg4: memref<8x1xf32, #tpu.memory_space<vmem>>, %arg5: memref<8x1xf32, #tpu.memory_space<vmem>>, %arg6: memref<8x1xf32, #tpu.memory_space<vmem>>) attributes {dimension_semantics = [#tpu.dimension_semantics<parallel>, #tpu.dimension_semantics<arbitrary>], iteration_bounds = array<i64: 1, 1>, scalar_prefetch = 0 : i64, scratch_operands = 2 : i64, tpu.core_type = #tpu.core_type<tc>, window_params = [{transform_indices = @transform_0, window_bounds = array<i64: 8, 256>}, {transform_indices = @transform_1, window_bounds = array<i64: 8, 1>}, {transform_indices = @transform_2, window_bounds = array<i64: 8, 1>}]} {
    %c0_i32 = arith.constant 0 : i32
    %0 = arith.cmpi eq, %arg1, %c0_i32 : i32
    %1 = arith.extui %0 : i1 to i32
    %c0_i32_0 = arith.constant 0 : i32
    %2 = arith.cmpi ne, %1, %c0_i32_0 : i32
    scf.if %2 {
      %cst_13 = arith.constant 0xFF800000 : f32
      %17 = vector.broadcast %cst_13 : f32 to vector<8x1xf32>
      %c0_14 = arith.constant 0 : index
      %c0_15 = arith.constant 0 : index
      %18 = vector.load %arg5[%c0_14, %c0_15] : memref<8x1xf32, #tpu.memory_space<vmem>>, vector<8x1xf32>
      tpu.vector_store %arg5[%c0_14, %c0_15], %17 {strides = array<i32>} : memref<8x1xf32, #tpu.memory_space<vmem>>, vector<8x1xf32>,
      %cst_16 = arith.constant 0.000000e+00 : f32
      %19 = vector.broadcast %cst_16 : f32 to vector<8x1xf32>
      %c0_17 = arith.constant 0 : index
      %c0_18 = arith.constant 0 : index
      %20 = vector.load %arg6[%c0_17, %c0_18] : memref<8x1xf32, #tpu.memory_space<vmem>>, vector<8x1xf32>
      tpu.vector_store %arg6[%c0_17, %c0_18], %19 {strides = array<i32>} : memref<8x1xf32, #tpu.memory_space<vmem>>, vector<8x1xf32>,
    } else {
    }
    %c0 = arith.constant 0 : index
    %c0_1 = arith.constant 0 : index
    %3 = vector.load %arg2[%c0, %c0_1] : memref<8x256xf32, #tpu.memory_space<vmem>>, vector<8x256xf32>
    %c0_2 = arith.constant 0 : index
    %c0_3 = arith.constant 0 : index
    %4 = vector.load %arg5[%c0_2, %c0_3] : memref<8x1xf32, #tpu.memory_space<vmem>>, vector<8x1xf32>
    %cst = arith.constant dense<0xFF800000> : vector<8xf32>
    %5 = vector.multi_reduction <maximumf>, %3, %cst [1] : vector<8x256xf32> to vector<8xf32>
    %6 = vector.shape_cast %5 : vector<8xf32> to vector<8x1xf32>
    %7 = arith.maximumf %4, %6 : vector<8x1xf32>
    %c0_4 = arith.constant 0 : index
    %c0_5 = arith.constant 0 : index
    %8 = vector.load %arg5[%c0_4, %c0_5] : memref<8x1xf32, #tpu.memory_space<vmem>>, vector<8x1xf32>
    tpu.vector_store %arg5[%c0_4, %c0_5], %7 {strides = array<i32>} : memref<8x1xf32, #tpu.memory_space<vmem>>, vector<8x1xf32>,
    %c0_6 = arith.constant 0 : index
    %c0_7 = arith.constant 0 : index
    %9 = vector.load %arg6[%c0_6, %c0_7] : memref<8x1xf32, #tpu.memory_space<vmem>>, vector<8x1xf32>
    %cst_8 = arith.constant dense<0.000000e+00> : vector<8xf32>
    %10 = vector.multi_reduction <add>, %3, %cst_8 [1] : vector<8x256xf32> to vector<8xf32>
    %11 = vector.shape_cast %10 : vector<8xf32> to vector<8x1xf32>
    %12 = arith.addf %9, %11 : vector<8x1xf32>
    %c0_9 = arith.constant 0 : index
    %c0_10 = arith.constant 0 : index
    %13 = vector.load %arg6[%c0_9, %c0_10] : memref<8x1xf32, #tpu.memory_space<vmem>>, vector<8x1xf32>
    tpu.vector_store %arg6[%c0_9, %c0_10], %12 {strides = array<i32>} : memref<8x1xf32, #tpu.memory_space<vmem>>, vector<8x1xf32>,
    %c0_i32_11 = arith.constant 0 : i32
    %14 = arith.cmpi eq, %arg1, %c0_i32_11 : i32
    %15 = arith.extui %14 : i1 to i32
    %c0_i32_12 = arith.constant 0 : i32
    %16 = arith.cmpi ne, %15, %c0_i32_12 : i32
    scf.if %16 {
      %c0_13 = arith.constant 0 : index
      %c0_14 = arith.constant 0 : index
      %17 = vector.load %arg5[%c0_13, %c0_14] : memref<8x1xf32, #tpu.memory_space<vmem>>, vector<8x1xf32>
      %c0_15 = arith.constant 0 : index
      %c0_16 = arith.constant 0 : index
      %18 = vector.load %arg3[%c0_15, %c0_16] : memref<8x1xf32, #tpu.memory_space<vmem>>, vector<8x1xf32>
      tpu.vector_store %arg3[%c0_15, %c0_16], %17 {strides = array<i32>} : memref<8x1xf32, #tpu.memory_space<vmem>>, vector<8x1xf32>,
      %c0_17 = arith.constant 0 : index
      %c0_18 = arith.constant 0 : index
      %19 = vector.load %arg6[%c0_17, %c0_18] : memref<8x1xf32, #tpu.memory_space<vmem>>, vector<8x1xf32>
      %cst_19 = arith.constant 3.906250e-03 : f32
      %20 = vector.broadcast %cst_19 : f32 to vector<8x1xf32>
      %21 = arith.mulf %19, %20 : vector<8x1xf32>
      %c0_20 = arith.constant 0 : index
      %c0_21 = arith.constant 0 : index
      %22 = vector.load %arg4[%c0_20, %c0_21] : memref<8x1xf32, #tpu.memory_space<vmem>>, vector<8x1xf32>
      tpu.vector_store %arg4[%c0_20, %c0_21], %21 {strides = array<i32>} : memref<8x1xf32, #tpu.memory_space<vmem>>, vector<8x1xf32>,
    } else {
    }
    return
  }
  func.func @transform_0(%arg0: i32, %arg1: i32) -> (i32, i32) {
    %c0_i32 = arith.constant 0 : i32
    return %arg0, %arg1 : i32, i32
  }
  func.func @transform_1(%arg0: i32, %arg1: i32) -> (i32, i32) {
    %c0_i32 = arith.constant 0 : i32
    %c0_i32_0 = arith.constant 0 : i32
    return %arg0, %c0_i32 : i32, i32
  }
  func.func @transform_2(%arg0: i32, %arg1: i32) -> (i32, i32) {
    %c0_i32 = arith.constant 0 : i32
    %c0_i32_0 = arith.constant 0 : i32
    return %arg0, %c0_i32 : i32, i32
  }
}

</mosaic_0001>

<bundles_post_ra>
// kernel: tpu_custom_call.1
= control target key start
LH: loop header
LB: loop body
LE: loop exit
PB: predicated region body
PF: predicated region fallthrough
CT: control target
= control target key end

     0   :  { %8 = vsyncpa [#allocation5], 0  ;;  %s88_s9 = smov [#allocation4]   ;;  %s130_s0 = inlined_call_operand.hbm [shape: f32[8,256], index: 0, kind: input, shape index: {}]   ;;  %s131_s1 = inlined_call_operand.vmem [shape: f32[8,1], index: 1, kind: output, shape index: {0}]   ;;  %s132_s2 = inlined_call_operand.vmem [shape: f32[8,1], index: 2, kind: output, shape index: {1}]  }
   0x1   :  { %s15_s10 = sshll.u32 %s88_s9, 4  ;;  %s64_s13 = scalar_lea.hbm %s130_s0, 256  ;;  %s16_s10 = int_to_ptr.vmem [resolvable:$true] %s15_s10 }
   0x2   :  { %p65_p0 = scmp.ne.s32.totalorder %s130_s0, %s64_s13  ;;  %p68_p1 = scmp.lt.u32.totalorder %s64_s13, %s130_s0 }
   0x4   :  { %p70_p2 = pnand %p68_p1, %p65_p0 }
   0x6   :  { %73 = shalt.err (!%p70_p2)
}
   0x7   :  { %s74_s18 = scalar_lea.vmem %s16_s10, 256  ;;  %p79_p4 = scmp.lt.s32.totalorder %s16_s10, %s16_s10 }
   0x8   :  { %p75_p3 = scmp.ne.s32.totalorder %s16_s10, %s74_s18  ;;  %p80_p5 = scmp.lt.s32.totalorder %s74_s18, %s74_s18 }
   0xa   :  { %p81_p6 = por %p80_p5, %p79_p4 }
   0xc   :  { %p82_p7 = pnand %p81_p6, %p75_p3 }
   0xe   :  { %85 = shalt.err (!%p82_p7)
}
   0xf   :  { %18 = dma.hbm_to_vmem [thread:$0]  %s130_s0, 256, %s16_s10, [#allocation5]  }
  0x10   :  { %86 = dma.done.wait [#allocation5], 256  }
  0x11   :  { %87 = vsyncadd [#allocation5], 4294967040  ;;  %vm26_vm0 = vcmask 7168   ;;  %v89_v0 = vmov 0.0   ;;  %v29_v1 = vld [vmem:[#allocation4] sm:$0xff]  ;;  %v30_v2 = vld [vmem:[#allocation4 + $0x8] sm:$0xff] }
  0x12   :  { %28 = vst.msk [vmem:[#allocation3] sm:$0xff] %vm26_vm0, %v89_v0  ;;  %v39_v3 = vadd.f32 %v30_v2, %v29_v1  ;;  %v32_v4 = vmax.f32 %v29_v1, %v30_v2  ;;  %v90_v5 = vmov -inf  }
  0x13   :  { %27 = vst.msk [vmem:[#allocation2] sm:$0xff] %vm26_vm0, %v90_v5 }
  0x14   :  { %40 = vadd.xlane.f32.xlu0 %v39_v3 }
  0x18   :  { %33 = vmax.xlane.f32.xlu0 %v32_v4 }
  0x19   :  { %v38_v6 = vld [vmem:[#allocation3] sm:$0xff] }
  0x1a   :  { %v31_v9 = vld [vmem:[#allocation2] sm:$0xff] }
  0xa1   :  { %v41_v7 = vpop.xlane.xlu0 %40 }
  0xa2   :  { %v42_v8 = vadd.f32 %v41_v7, %v38_v6 }
  0xa4   :  { %43 = vst.msk [vmem:[#allocation3] sm:$0xff] %vm26_vm0, %v42_v8 }
  0xa5   :  { %v34_v10 = vpop.xlane.xlu0 %33 }
  0xa6   :  { %v35_v11 = vmax.f32 %v31_v9, %v34_v10 }
  0xa8   :  { %37 = vst.msk [vmem:[#allocation2] sm:$0xff] %vm26_vm0, %v35_v11 }
  0xab   :  { %v49_v12 = vld [vmem:[#allocation3] sm:$0xff] }
  0xac   :  { %v50_v13 = vmul.f32 0.00390625, %v49_v12 }
  0xae   :  { %51 = vst.msk [vmem:[%s132_s2] sm:$0xff] %vm26_vm0, %v50_v13 }
  0xaf   :  { %v47_v14 = vld [vmem:[#allocation2] sm:$0xff] }
  0xb0   :  { %48 = vst.msk [vmem:[%s131_s1] sm:$0xff] %vm26_vm0, %v47_v14 }
  0xb1   :  { %60 = vsyncpa [#allocation5], 1 }

</bundles_post_ra>
